<compile_context>
chip_gen: v6e
topology: v6e:2x2x1
jax: 0.10.0
libtpu: 0.0.40
codegen_flags: <defaults>
</compile_context>

<pallas_src>
import functools

import jax
import jax.numpy as jnp
from jax.experimental import pallas as pl
from jax.experimental.pallas import tpu as pltpu


_LANE = 128
_SUBLANE = 8
_VMEM_FALLBACK_BYTES = 64 * 1024 * 1024   # v7x-safe if get_tpu_info is unavailable
_VMEM_HEADROOM_BYTES = 4 * 1024 * 1024    # compiler-internal scratch headroom


def _get_activation(name):
    acts = {
        "relu": lambda v: jnp.maximum(v, 0.0),
        # PyTorch nn.GELU default is exact (erf-based) GELU.
        "gelu": functools.partial(jax.nn.gelu, approximate=False),
        "gelu_new": functools.partial(jax.nn.gelu, approximate=True),
        "silu": jax.nn.silu,
        "swish": jax.nn.silu,
        "tanh": jnp.tanh,
    }
    return acts[name]


def _round_up(x, m):
    return ((x + m - 1) // m) * m


def _cdiv(a, b):
    return (a + b - 1) // b


def _vmem_budget():
    """(vmem_limit_bytes, streamed-tile budget) from the chip's real VMEM."""
    try:
        cap = int(pltpu.get_tpu_info().vmem_capacity_bytes)
    except Exception:  # robustness: emulator / older jax
        cap = _VMEM_FALLBACK_BYTES
    # v5e/v6e (128 MiB) -> 96 MiB scoped limit; v7x (64 MiB) -> 48 MiB.
    limit = min(cap * 3 // 4, 100 * 1024 * 1024)
    budget = max(limit - _VMEM_HEADROOM_BYTES, 8 * 1024 * 1024)
    return int(limit), int(budget)


def _choose_tm(m, dim, r, itemsize, budget_bytes):
    """Biggest row tile whose full VMEM footprint fits the budget."""
    tm = 1024 if itemsize <= 2 else 512
    tm = min(tm, _round_up(max(m, 1), _SUBLANE))
    tm = max(_SUBLANE, _round_up(tm, _SUBLANE))

    def need(t):
        streamed = 3 * 2 * t * dim * itemsize      # x, res, out (double-buffered)
        f32_tmp = 2 * t * dim * 4                  # f32 dot result + epilogue temp
        h_tmp = 2 * t * r * 4                      # bottleneck activations
        weights = 2 * 2 * dim * r * itemsize       # A^T, B^T (double-buffered)
        return streamed + f32_tmp + h_tmp + weights

    while tm > _SUBLANE and need(tm) > budget_bytes:
        tm = max(_SUBLANE, _round_up(tm // 2, _SUBLANE))
    return tm


def _even_grid_tm(m, tm):
    """Prefer a tm whose grid length is even (balances v7x's 2 TensorCores)."""
    if m <= tm:
        return tm
    if _cdiv(m, tm) % 2 == 0:
        return tm
    cand = tm - _SUBLANE
    floor = max(_SUBLANE, tm // 2)
    while cand >= floor:
        if _cdiv(m, cand) % 2 == 0:
            return cand
        cand -= _SUBLANE
    return tm


def adapter_kernel(x_ref, res_ref, wa_ref, wb_ref, o_ref, *, act_fn):
    # x_ref:  (tm, dim)   res_ref: (tm, dim)
    # wa_ref: (dim, r)    wb_ref:  (r, dim)
    h = jnp.dot(x_ref[...], wa_ref[...], preferred_element_type=jnp.float32)
    h = act_fn(h)
    out = jnp.dot(h.astype(wb_ref.dtype), wb_ref[...],
                  preferred_element_type=jnp.float32)
    # Residual add in the streamed dtype (matches PyTorch; one fewer f32 temp).
    o_ref[...] = out.astype(o_ref.dtype) + res_ref[...]


def adapter_forward(x, residual, w_a, w_b, *, act="relu"):
    """x, residual: (batch, seq, dim). w_a: (r, dim), w_b: (dim, r) (torch layout)."""
    batch, seq, dim = x.shape
    r = w_a.shape[0]
    M = batch * seq

    dtype = x.dtype
    itemsize = jnp.dtype(dtype).itemsize

    vmem_limit, budget = _vmem_budget()
    tm = _choose_tm(M, dim, r, itemsize, budget)
    tm = _even_grid_tm(M, tm)
    grid = _cdiv(M, tm)

    x2 = x.reshape(M, dim)
    res2 = residual.reshape(M, dim)
    # Pre-transpose weights so the kernel computes x @ A^T @ B^T directly.
    a_t = w_a.T.astype(dtype)              # (dim, r)
    b_t = w_b.T.astype(dtype)              # (r, dim)

    kernel = functools.partial(adapter_kernel, act_fn=_get_activation(act))

    out2 = pl.pallas_call(
        kernel,
        out_shape=jax.ShapeDtypeStruct((M, dim), dtype),
        grid_spec=pltpu.PrefetchScalarGridSpec(
            num_scalar_prefetch=0,
            grid=(grid,),
            in_specs=[
                pl.BlockSpec((tm, dim), lambda i: (i, 0)),   # x row tile
                pl.BlockSpec((tm, dim), lambda i: (i, 0)),   # residual row tile
                pl.BlockSpec((dim, r), lambda i: (0, 0)),    # A^T (resident)
                pl.BlockSpec((r, dim), lambda i: (0, 0)),    # B^T (resident)
            ],
            out_specs=pl.BlockSpec((tm, dim), lambda i: (i, 0)),
        ),
        compiler_params=pltpu.CompilerParams(
            dimension_semantics=("parallel",),
            vmem_limit_bytes=vmem_limit,
        ),
    )(x2, res2, a_t, b_t)

    return out2.reshape(batch, seq, dim)


def adapter_ref(x, residual, w_a, w_b, act="relu"):
    act_fn = _get_activation(act)
    h = jnp.einsum("bsd,rd->bsr", x, w_a)
    h = act_fn(h)
    out = jnp.einsum("bsr,dr->bsd", h, w_b)
    return out + residual


if __name__ == "__main__":
    key = jax.random.PRNGKey(0)

    # Case 1: small canonical shapes, dim not a multiple of 128 (masked tail
    # stores), relu activation.
    batch, seq, dim, r = 2, 8, 32, 8
    k1, k2, k3, k4, k5 = jax.random.split(key, 5)
    x = jax.random.normal(k1, (batch, seq, dim), dtype=jnp.float32)
    residual = jax.random.normal(k2, (batch, seq, dim), dtype=jnp.float32)
    # nn.Linear(dim, r).weight -> (r, dim); nn.Linear(r, dim).weight -> (dim, r)
    w_a = jax.random.normal(k3, (r, dim), dtype=jnp.float32) * 0.1
    w_b = jax.random.normal(k4, (dim, r), dtype=jnp.float32) * 0.1

    out = jax.block_until_ready(adapter_forward(x, residual, w_a, w_b, act="relu"))
    ref = adapter_ref(x, residual, w_a, w_b, act="relu")
    assert out.shape == (batch, seq, dim)
    assert jnp.allclose(out, ref, atol=1e-5, rtol=1e-5), "case 1 mismatch vs reference"

    # Case 2: ragged row count (M=15) and unaligned dim (boundary-block
    # masking, no host padding), silu activation.
    b2, s2, d2, r2 = 3, 5, 40, 4
    ka, kb, kc, kd, ke = jax.random.split(k5, 5)
    x2 = jax.random.normal(ka, (b2, s2, d2), dtype=jnp.float32)
    res2 = jax.random.normal(kb, (b2, s2, d2), dtype=jnp.float32)
    wa2 = jax.random.normal(kc, (r2, d2), dtype=jnp.float32) * 0.1
    wb2 = jax.random.normal(kd, (d2, r2), dtype=jnp.float32) * 0.1

    out2 = jax.block_until_ready(adapter_forward(x2, res2, wa2, wb2, act="silu"))
    ref2 = adapter_ref(x2, res2, wa2, wb2, act="silu")
    assert out2.shape == (b2, s2, d2)
    assert jnp.allclose(out2, ref2, atol=1e-5, rtol=1e-5), "case 2 mismatch vs reference"

    # Case 3: multi-tile grid with a ragged last row tile (M=600, tm=512 ->
    # grid of 2 with the second tile partially out of bounds), relu.
    b3, s3, d3, r3 = 2, 300, 256, 16
    kq, kr, ks, kt = jax.random.split(ke, 4)
    x3 = jax.random.normal(kq, (b3, s3, d3), dtype=jnp.float32)
    res3 = jax.random.normal(kr, (b3, s3, d3), dtype=jnp.float32)
    wa3 = jax.random.normal(ks, (r3, d3), dtype=jnp.float32) * 0.1
    wb3 = jax.random.normal(kt, (d3, r3), dtype=jnp.float32) * 0.1

    out3 = jax.block_until_ready(adapter_forward(x3, res3, wa3, wb3, act="relu"))
    ref3 = adapter_ref(x3, res3, wa3, wb3, act="relu")
    assert out3.shape == (b3, s3, d3)
    # Looser tolerance: the XLA reference einsum may use a different MXU
    # precision path than the in-kernel f32-accumulated dots.
    assert jnp.allclose(out3, ref3, atol=2e-2, rtol=2e-2), "case 3 mismatch vs reference"

    print("KERNEL_OK")
</pallas_src>

<mosaic_0001>
module attributes {stable_mosaic.version = 11 : i64} {
  func.func @adapter_kernel(%arg0: i32, %arg1: memref<16x32xf32, #tpu.memory_space<vmem>>, %arg2: memref<16x32xf32, #tpu.memory_space<vmem>>, %arg3: memref<32x8xf32, #tpu.memory_space<vmem>>, %arg4: memref<8x32xf32, #tpu.memory_space<vmem>>, %arg5: memref<16x32xf32, #tpu.memory_space<vmem>>) attributes {dimension_semantics = [#tpu.dimension_semantics<parallel>], iteration_bounds = array<i64: 1>, scalar_prefetch = 0 : i64, scratch_operands = 0 : i64, tpu.core_type = #tpu.core_type<tc>, window_params = [{transform_indices = @transform_0, window_bounds = array<i64: 16, 32>}, {transform_indices = @transform_1, window_bounds = array<i64: 16, 32>}, {pipeline_mode = #tpu.pipeline_mode<synchronous>, transform_indices = @transform_2, window_bounds = array<i64: 32, 8>}, {pipeline_mode = #tpu.pipeline_mode<synchronous>, transform_indices = @transform_3, window_bounds = array<i64: 8, 32>}, {transform_indices = @transform_4, window_bounds = array<i64: 16, 32>}]} {
    %c0 = arith.constant 0 : index
    %c0_0 = arith.constant 0 : index
    %0 = vector.load %arg1[%c0, %c0_0] : memref<16x32xf32, #tpu.memory_space<vmem>>, vector<16x32xf32>
    %c0_1 = arith.constant 0 : index
    %c0_2 = arith.constant 0 : index
    %1 = vector.load %arg3[%c0_1, %c0_2] : memref<32x8xf32, #tpu.memory_space<vmem>>, vector<32x8xf32>
    %cst = arith.constant dense<0.000000e+00> : vector<16x8xf32>
    %2 = tpu.matmul %0, %1, %cst {dimension_numbers = #tpu.dot_dimension_numbers<[1], [0], [0], [1], [0, 0, 1, 1], [], []>} : vector<16x32xf32>, vector<32x8xf32>, vector<16x8xf32> -> vector<16x8xf32>
    %cst_3 = arith.constant 0.000000e+00 : f32
    %3 = vector.broadcast %cst_3 : f32 to vector<16x8xf32>
    %4 = arith.maximumf %2, %3 : vector<16x8xf32>
    %c0_4 = arith.constant 0 : index
    %c0_5 = arith.constant 0 : index
    %5 = vector.load %arg4[%c0_4, %c0_5] : memref<8x32xf32, #tpu.memory_space<vmem>>, vector<8x32xf32>
    %cst_6 = arith.constant dense<0.000000e+00> : vector<16x32xf32>
    %6 = tpu.matmul %4, %5, %cst_6 {dimension_numbers = #tpu.dot_dimension_numbers<[1], [0], [0], [1], [0, 0, 1, 1], [], []>} : vector<16x8xf32>, vector<8x32xf32>, vector<16x32xf32> -> vector<16x32xf32>
    %c0_7 = arith.constant 0 : index
    %c0_8 = arith.constant 0 : index
    %7 = vector.load %arg2[%c0_7, %c0_8] : memref<16x32xf32, #tpu.memory_space<vmem>>, vector<16x32xf32>
    %8 = arith.addf %6, %7 : vector<16x32xf32>
    %c0_9 = arith.constant 0 : index
    %c0_10 = arith.constant 0 : index
    %9 = vector.load %arg5[%c0_9, %c0_10] : memref<16x32xf32, #tpu.memory_space<vmem>>, vector<16x32xf32>
    tpu.vector_store %arg5[%c0_9, %c0_10], %8 {strides = array<i32>} : memref<16x32xf32, #tpu.memory_space<vmem>>, vector<16x32xf32>,
    return
  }
  func.func @transform_0(%arg0: i32) -> (i32, i32) {
    %c0_i32 = arith.constant 0 : i32
    %c0_i32_0 = arith.constant 0 : i32
    return %arg0, %c0_i32 : i32, i32
  }
  func.func @transform_1(%arg0: i32) -> (i32, i32) {
    %c0_i32 = arith.constant 0 : i32
    %c0_i32_0 = arith.constant 0 : i32
    return %arg0, %c0_i32 : i32, i32
  }
  func.func @transform_2(%arg0: i32) -> (i32, i32) {
    %c0_i32 = arith.constant 0 : i32
    %c0_i32_0 = arith.constant 0 : i32
    %c0_i32_1 = arith.constant 0 : i32
    return %c0_i32, %c0_i32_0 : i32, i32
  }
  func.func @transform_3(%arg0: i32) -> (i32, i32) {
    %c0_i32 = arith.constant 0 : i32
    %c0_i32_0 = arith.constant 0 : i32
    %c0_i32_1 = arith.constant 0 : i32
    return %c0_i32, %c0_i32_0 : i32, i32
  }
  func.func @transform_4(%arg0: i32) -> (i32, i32) {
    %c0_i32 = arith.constant 0 : i32
    %c0_i32_0 = arith.constant 0 : i32
    return %arg0, %c0_i32 : i32, i32
  }
}

</mosaic_0001>

<bundles_post_ra>
// kernel: tpu_custom_call.1
= control target key start
LH: loop header
LB: loop body
LE: loop exit
PB: predicated region body
PF: predicated region fallthrough
CT: control target
= control target key end

     0   :  { %vm24_vm0 = vcmask 261120   ;;  %s327_s0 = inlined_call_operand.vmem [shape: f32[16,32], index: 0, kind: input, shape index: {}]   ;;  %s328_s1 = inlined_call_operand.vmem [shape: f32[16,32], index: 1, kind: input, shape index: {}]   ;;  %s329_s2 = inlined_call_operand.vmem [shape: f32[32,8], index: 2, kind: input, shape index: {}]   ;;  %s330_s3 = inlined_call_operand.vmem [shape: f32[8,32], index: 3, kind: input, shape index: {}]   ;;  %s331_s4 = inlined_call_operand.hbm [shape: f32[16,32], index: 4, kind: output, shape index: {}]  }
   0x1   :  { %v23_v0 = vld [vmem:[%s329_s2 + $0x18] sm:$0xff]  ;;  %v22_v1 = vld [vmem:[%s329_s2 + $0x10] sm:$0xff]  ;;  %v18_v2 = vld [vmem:[%s327_s0] sm:$0xff] }
   0x2   :  { %224 = vmatprep.subr.mxu0 %v23_v0  ;;  %v21_v3 = vld [vmem:[%s329_s2 + $0x8] sm:$0xff]  ;;  %232 = vmatprep.mubr.msk.f32.mxu0 %vm24_vm0, %v18_v2 }
   0x3   :  { %225 = vmatpush3.msra.mxu0 %v23_v0 }
   0x4   :  { %9 = vsyncpa [#allocation3], 0  ;;  %226 = vmatprep.subr.mxu0 %v22_v1  ;;  %v20_v4 = vld [vmem:[%s329_s2] sm:$0xff]  ;;  %v19_v5 = vld [vmem:[%s327_s0 + $0x8] sm:$0xff]  ;;  %vm111_vm1 = vcmask 64512   ;;  %s265_s0 = smov [#allocation2]  }
   0x5   :  { %227 = vmatpush3.msra.mxu0 %v22_v1  ;;  %v108_v6 = vld [vmem:[%s330_s3] sm:$0xff]  ;;  %v110_v11 = vld [vmem:[%s328_s1 + $0x8] sm:$0xff]  ;;  %s200_s30 = sshll.u32 %s265_s0, 4  ;;  %s201_s30 = int_to_ptr.vmem [resolvable:$true] %s200_s30 }
   0x6   :  { %228 = vmatprep.subr.mxu0 %v21_v3  ;;  %235 = vmatprep.subr.mxu1 %v108_v6  ;;  %v109_v13 = vld [vmem:[%s328_s1] sm:$0xff]  ;;  %s243_s3 = scalar_lea.vmem %s201_s30, 256  ;;  %p248_p1 = scmp.lt.s32.totalorder %s201_s30, %s201_s30 }
   0x7   :  { %229 = vmatpush3.msra.mxu0 %v21_v3  ;;  %236 = vmatpush3.msra.mxu1 %v108_v6  ;;  %p244_p0 = scmp.ne.s32.totalorder %s201_s30, %s243_s3  ;;  %p249_p2 = scmp.lt.s32.totalorder %s243_s3, %s243_s3 }
   0x8   :  { %230 = vmatprep.subr.mxu0 %v20_v4 }
   0x9   :  { %231 = vmatpush3.msra.mxu0 %v20_v4  ;;  %p250_p3 = por %p249_p2, %p248_p1 }
   0xa   :  { %233 = vmatmul.mubr.msk.f32.vlgmr.msra.gmra.mxu0 %vm24_vm0, %v19_v5 }
   0xb   :  { %p251_p4 = pnand %p250_p3, %p244_p0 }
  0xca   :  { %v234_v7 = vpop.f32.mrf.mxu0 }
  0xcb   :  { %v107_v10 = vmax.f32 %v234_v7, 0.0 }
  0xcc   :  { %v97_v8 = vpop.f32.mrf.mxu0 }
  0xcd   :  { %v106_v9 = vmax.f32 %v97_v8, 0.0 }
  0xcf   :  { %237 = vmatprep.mubr.msk.f32.mxu1 %vm111_vm1, %v106_v9 }
  0xd0   :  { %238 = vmatmul.mubr.msk.f32.vlgmr.msra.gmra.mxu1 %vm111_vm1, %v107_v10 }
 0x190   :  { %v239_v12 = vpop.f32.mrf.mxu1 }
 0x191   :  { %v190_v14 = vadd.f32 %v239_v12, %v110_v11 }
 0x192   :  { %v184_v15 = vpop.f32.mrf.mxu1 }
 0x193   :  { %194 = vst.msk [vmem:[#allocation2 + $0x8] sm:$0xff] %vm24_vm0, %v190_v14  ;;  %v185_v16 = vadd.f32 %v184_v15, %v109_v13 }
 0x195   :  { %193 = vst.msk [vmem:[#allocation2] sm:$0xff] %vm24_vm0, %v185_v16 }
 0x196   :  { %254 = shalt.err (!%p251_p4)
}
 0x197   :  { %s266_s7 = smov 128   ;;  %s267_s8 = smov 8  }
 0x198   :  { %206 = dma.vmem_to_hbm [thread:$0]  %s201_s30, 256, %s331_s4, [#allocation3], %s266_s7, %s266_s7, %s267_s8  }
 0x199   :  { %263 = dma.done.wait [#allocation3], 256  }
 0x19a   :  { %264 = vsyncadd [#allocation3], 4294967040 }
 0x19b   :  { %210 = vsyncpa [#allocation3], 1 }

</bundles_post_ra>
